<compile_context>
chip_gen: v5e
topology: v5e:2x2
jax: 0.10.0
libtpu: 0.0.40
codegen_flags: <defaults>
</compile_context>

<pallas_src>
import functools

import jax
import jax.numpy as jnp
from jax import lax
from jax.experimental import pallas as pl
from jax.experimental.pallas import tpu as pltpu


def _r8(n):
    return ((n + 7) // 8) * 8


def _r128(n):
    return ((n + 127) // 128) * 128


def _vmem_capacity_bytes():
    try:
        info = pltpu.get_tpu_info()
        cap = getattr(info, "vmem_capacity_bytes", None)
        if cap:
            return int(cap)
    except Exception:
        pass
    return 64 * 2**20   # conservative default (v7x per-TensorCore VMEM)


def _vmem_need_bytes(TB, BB, D, H, out_lanes, mm_bytes):
    """Rough per-core VMEM working set (lane/sublane padded)."""
    G = 4 * H
    x_blk = 2 * TB * _r8(BB) * _r128(D) * 4                      # double-buffered f32 x block
    gx = TB * _r8(BB) * _r128(G) * 4                             # time-major gate scratch (f32)
    wts = 2 * (2 * _r8(D) * _r128(G)                             # wih_f, wih_b
               + _r8(H) * _r128(G)                               # whh_f
               + _r8(2 * H) * _r128(out_lanes)) * mm_bytes       # fused heads
    biases = 2 * (2 * 8 * _r128(G) + 8 * _r128(out_lanes)) * 4
    state = 2 * _r8(BB) * _r128(H) * 4                           # carried h, c
    out_blk = 2 * _r8(BB) * _r128(out_lanes) * 4
    return x_blk + gx + wts + biases + state + out_blk


def _pick_tiles(B, T, D, H, out_lanes, *, time_block_cap, batch_block, mm_bytes, vmem_budget):
    """Pick (TB, BB, Bp): exact time blocks, 8-multiple batch blocks, fits the VMEM budget."""
    B8 = _r8(max(B, 1))
    if B8 <= 8:
        BB = 8
    else:
        # Target >= 2 batch blocks (v7x megacore: one per TensorCore), capped by batch_block.
        BB = max(8, min((batch_block // 8) * 8, _r8((B8 + 1) // 2)))

    cands = [tb for tb in range(min(time_block_cap, T), 7, -1) if T % tb == 0]
    if not cands:
        # TODO(synk): awkward (e.g. prime) T with no divisor >= 8 under the cap falls back to
        # one resident block; masking of a padded time axis is not implemented.
        cands = [T]

    TB = None
    for cand in cands:
        if _vmem_need_bytes(cand, BB, D, H, out_lanes, mm_bytes) <= vmem_budget:
            TB = cand
            break
    if TB is None:
        TB = cands[-1]
        while BB > 8 and _vmem_need_bytes(TB, BB, D, H, out_lanes, mm_bytes) > vmem_budget:
            BB -= 8

    Bp = ((B8 + BB - 1) // BB) * BB
    return TB, BB, Bp


def lstm_block_kernel(x_ref,                              # (TB, BB, D) time-major x block (f32)
                      wih_f_ref, whh_f_ref, bias_f_ref,   # fwd: (D,4H) mm, (H,4H) mm, (1,4H) f32
                      wih_b_ref, bias_b_ref,              # bwd: (D,4H) mm, (1,4H) f32
                      w_head_ref, b_head_ref,             # fused heads: (2H,128) mm, (1,128) f32
                      out_ref,                            # (BB, 128) lane-dense output
                      gx_ref, h_ref, c_ref,               # scratch: (TB,BB,4H) f32, (BB,H) f32 x2
                      *, H, TB, BB, unroll):
    G = 4 * H
    tb = pl.program_id(1)
    n_tb = pl.num_programs(1)
    D = x_ref.shape[2]
    mm_dtype = wih_f_ref.dtype          # matmul operand dtype (bf16 by default, f32 optional)

    # Fresh recurrent state at the start of each sequence (per batch block; tb is innermost).
    @pl.when(tb == 0)
    def _():
        h_ref[...] = jnp.zeros_like(h_ref)
        c_ref[...] = jnp.zeros_like(c_ref)

    # ---- Hoisted input projection for the whole time block (off the serial chain):
    # one (TB*BB, D) x (D, 4H) MXU matmul with the bias folded in, landing in the time-major
    # gate scratch with ONE contiguous store (no sublane-masked scatter).
    x_flat = x_ref[...].reshape(TB * BB, D).astype(mm_dtype)
    proj = (jnp.dot(x_flat, wih_f_ref[...], preferred_element_type=jnp.float32)
            + bias_f_ref[...])
    gx_ref[...] = proj.reshape(TB, BB, G)

    # Gate-activation lane mask (hoisted). Lanes [2H,3H) are the cell gate g (true tanh);
    # all other lanes use sigmoid(x) = 0.5*(tanh(x/2)+1), recovered from the SAME tanh ->
    # one EUP transcendental per step instead of two.
    lane = lax.broadcasted_iota(jnp.int32, (BB, G), 1)
    g_mask = (lane >= 2 * H) & (lane < 3 * H)

    whh_f = whh_f_ref[...]   # loop-invariant MXU RHS (Mosaic latches it across the loop)
    # TODO(synk): if a bundle dump shows the RHS re-pushed per step, drive the MXU explicitly
    # (pltpu.matmul_push_rhs once + matmul_acc_lhs/matmul_pop per step; MRB accumulate on v7x).

    def step(t, carry):
        h, c = carry
        # Only this (BB,H)x(H,4H) matmul + one tanh + a few VPU ops sit on the serial chain.
        gates = gx_ref[t] + jnp.dot(h.astype(mm_dtype), whh_f,
                                    preferred_element_type=jnp.float32)
        th = jnp.tanh(jnp.where(g_mask, gates, 0.5 * gates))        # single full-vreg EUP op
        act = jnp.where(g_mask, th, 0.5 * th + 0.5)                 # sigmoid lanes recovered
        i_g = act[:, 0 * H:1 * H]
        f_g = act[:, 1 * H:2 * H]
        g_g = act[:, 2 * H:3 * H]
        o_g = act[:, 3 * H:4 * H]
        c = f_g * c + i_g * g_g
        h = o_g * jnp.tanh(c)
        return h, c

    h_f, c_f = lax.fori_loop(0, TB, step, (h_ref[...], c_ref[...]), unroll=unroll)
    h_ref[...] = h_f
    c_ref[...] = c_f

    # ---- Final time block: reverse direction = one step from zero state on x[:, T-1, :]
    # (exactly out[:, -1, H:] of a PyTorch bi-LSTM) + both linear heads fused in one matmul.
    @pl.when(tb == n_tb - 1)
    def _():
        x_last = x_ref[TB - 1, :, :].astype(mm_dtype)                  # (BB, D), static index
        gates_b = (jnp.dot(x_last, wih_b_ref[...], preferred_element_type=jnp.float32)
                   + bias_b_ref[...])                                  # h0 = 0 -> no Whh term
        th_b = jnp.tanh(jnp.where(g_mask, gates_b, 0.5 * gates_b))
        act_b = jnp.where(g_mask, th_b, 0.5 * th_b + 0.5)
        c_b = act_b[:, 0:H] * act_b[:, 2 * H:3 * H]                    # i*g   (f*c0 = 0)
        h_b = act_b[:, 3 * H:4 * H] * jnp.tanh(c_b)                    # o*tanh(c)
        hcat = jnp.concatenate([h_f, h_b], axis=1).astype(mm_dtype)    # (BB, 2H)
        # Both heads fused into one lane-padded matmul -> one unmasked (BB,128) store.
        out_ref[...] = (jnp.dot(hcat, w_head_ref[...], preferred_element_type=jnp.float32)
                        + b_head_ref[...])


def lstm_block_forward(x, params, *, time_block_cap=1024, batch_block=64, use_bf16=True):
    """x: (B, T, D) f32 batch-first (same as the PyTorch module). Returns ((B,4), (B,2))."""
    B, T, D = x.shape
    H = params["whh_f"].shape[0]
    G = 4 * H
    od1 = params["w1"].shape[1]
    od2 = params["w2"].shape[1]
    OUT_LANES = 128
    assert od1 + od2 <= OUT_LANES

    mm_dtype = jnp.bfloat16 if use_bf16 else jnp.float32
    mm_bytes = 2 if use_bf16 else 4

    vmem_cap = _vmem_capacity_bytes()
    vmem_budget = int(0.70 * vmem_cap)
    TB, BB, Bp = _pick_tiles(B, T, D, H, OUT_LANES,
                             time_block_cap=time_block_cap, batch_block=batch_block,
                             mm_bytes=mm_bytes, vmem_budget=vmem_budget)
    n_tb = T // TB
    n_bb = Bp // BB

    # Pad only the batch axis; time axis is streamed in exact blocks (semantics preserved).
    x_p = x if Bp == B else jnp.pad(x, ((0, Bp - B), (0, 0), (0, 0)))
    x_tm = jnp.transpose(x_p, (1, 0, 2))          # time-major (T, Bp, D): contiguous gx store

    # Weights pre-cast to the MXU operand dtype; biases stay f32 (added after f32-accum dot).
    wih_f = params["wih_f"].astype(mm_dtype)
    whh_f = params["whh_f"].astype(mm_dtype)
    wih_b = params["wih_b"].astype(mm_dtype)
    b_f = params["b_f"].astype(jnp.float32)
    b_b = params["b_b"].astype(jnp.float32)

    # Fused + lane-padded output heads: cols [0,od1) = linear1, [od1,od1+od2) = linear2.
    w_head = jnp.zeros((2 * H, OUT_LANES), jnp.float32)
    w_head = w_head.at[:, :od1].set(params["w1"]).at[:, od1:od1 + od2].set(params["w2"])
    w_head = w_head.astype(mm_dtype)
    b_head = jnp.zeros((1, OUT_LANES), jnp.float32)
    b_head = b_head.at[:, :od1].set(params["b1"]).at[:, od1:od1 + od2].set(params["b2"])

    unroll = 8 if TB % 8 == 0 else (4 if TB % 4 == 0 else (2 if TB % 2 == 0 else 1))

    kernel = functools.partial(lstm_block_kernel, H=H, TB=TB, BB=BB, unroll=unroll)

    def full_spec(a):
        return pl.BlockSpec(a.shape, lambda bb, tb, _nd=a.ndim: (0,) * _nd)

    in_specs = [
        pl.BlockSpec((TB, BB, D), lambda bb, tb: (tb, bb, 0)),   # x: streamed time-major blocks
        full_spec(wih_f), full_spec(whh_f), full_spec(b_f),
        full_spec(wih_b), full_spec(b_b),
        full_spec(w_head), full_spec(b_head),
    ]
    out_specs = pl.BlockSpec((BB, OUT_LANES), lambda bb, tb: (bb, 0))

    need = _vmem_need_bytes(TB, BB, D, H, OUT_LANES, mm_bytes)
    vmem_limit = int(min(0.9 * vmem_cap, max(32 * 2**20, need + (8 << 20))))
    vmem_limit = max(vmem_limit, need)             # never under-provision the chosen tiles

    cost = pl.CostEstimate(
        flops=int(2 * Bp * T * G * (D + H) + 2 * Bp * (G * D + 2 * H * OUT_LANES)),
        transcendentals=int(Bp * (T + 1) * (G + H)),
        bytes_accessed=int(4 * x_p.size + mm_bytes * (2 * D * G + H * G + 2 * H * OUT_LANES)
                           + 4 * (2 * G + OUT_LANES + Bp * OUT_LANES)),
    )

    out = pl.pallas_call(
        kernel,
        out_shape=jax.ShapeDtypeStruct((Bp, OUT_LANES), jnp.float32),
        grid_spec=pltpu.PrefetchScalarGridSpec(
            num_scalar_prefetch=0,
            grid=(n_bb, n_tb),
            in_specs=in_specs,
            out_specs=out_specs,
            scratch_shapes=[
                pltpu.VMEM((TB, BB, G), jnp.float32),   # time-major hoisted input gates
                pltpu.VMEM((BB, H), jnp.float32),       # carried h (persists across T blocks)
                pltpu.VMEM((BB, H), jnp.float32),       # carried c
            ]),
        compiler_params=pltpu.CompilerParams(
            dimension_semantics=("parallel", "arbitrary"),   # batch across cores, serial time
            vmem_limit_bytes=vmem_limit),
        cost_estimate=cost,
    )(x_tm, wih_f, whh_f, b_f, wih_b, b_b, w_head, b_head)

    return out[:B, :od1], out[:B, od1:od1 + od2]


def reference_forward(x, p):
    """Pure-JAX f32 reference of the same math (for correctness check)."""
    B, T, D = x.shape
    H = p["whh_f"].shape[0]

    def cell(x_t, h, c, wih, whh, b):
        gates = x_t @ wih + h @ whh + b
        i_g = jax.nn.sigmoid(gates[:, :H])
        f_g = jax.nn.sigmoid(gates[:, H:2 * H])
        g_g = jnp.tanh(gates[:, 2 * H:3 * H])
        o_g = jax.nn.sigmoid(gates[:, 3 * H:])
        c = f_g * c + i_g * g_g
        h = o_g * jnp.tanh(c)
        return h, c

    h = jnp.zeros((B, H), jnp.float32)
    c = jnp.zeros((B, H), jnp.float32)
    for t in range(T):
        h, c = cell(x[:, t, :], h, c, p["wih_f"], p["whh_f"], p["b_f"])
    hb, _ = cell(x[:, -1, :], jnp.zeros((B, H)), jnp.zeros((B, H)),
                 p["wih_b"], p["whh_b"], p["b_b"])
    hcat = jnp.concatenate([h, hb], axis=1)
    return hcat @ p["w1"] + p["b1"], hcat @ p["w2"] + p["b2"]


def init_params(key, input_dim, hidden_dim, output_dim=4):
    """Deterministic synthetic parameters (PyTorch-style uniform(-1/sqrt(H), 1/sqrt(H)))."""
    H, D = hidden_dim, input_dim
    k = 1.0 / jnp.sqrt(jnp.float32(H))
    keys = jax.random.split(key, 12)
    u = lambda kk, shape: jax.random.uniform(kk, shape, jnp.float32, -k, k)
    return {
        # Weights stored pre-transposed for x @ W layout.
        "wih_f": u(keys[0], (D, 4 * H)),
        "whh_f": u(keys[1], (H, 4 * H)),
        "b_f":   u(keys[2], (1, 4 * H)) + u(keys[3], (1, 4 * H)),  # b_ih + b_hh
        "wih_b": u(keys[4], (D, 4 * H)),
        "whh_b": u(keys[5], (H, 4 * H)),                           # unused by kernel (h0 = 0)
        "b_b":   u(keys[6], (1, 4 * H)) + u(keys[7], (1, 4 * H)),
        "w1":    u(keys[8], (2 * H, output_dim)),
        "b1":    u(keys[9], (1, output_dim)),
        "w2":    u(keys[10], (2 * H, 2)),
        "b2":    u(keys[11], (1, 2)),
    }


if __name__ == "__main__":
    # Small shapes consistent with the module's forward (module uses T=3000; demo uses T=8).
    B, T, D, H = 2, 8, 8, 32

    key = jax.random.PRNGKey(0)
    kx, kp = jax.random.split(key)
    x = jax.random.normal(kx, (B, T, D), jnp.float32)
    params = init_params(kp, input_dim=D, hidden_dim=H, output_dim=4)

    ref1, ref2 = reference_forward(x, params)

    # Optimized path: bf16 MXU operands, f32 accumulation / cell state, single-tanh gates.
    # NOTE: re-validate at the production T=3000 before loosening tolerances further.
    out1, out2 = lstm_block_forward(x, params, use_bf16=True)
    out1, out2 = jax.block_until_ready((out1, out2))
    assert out1.shape == (B, 4) and out2.shape == (B, 2)
    assert jnp.allclose(out1, ref1, rtol=2e-2, atol=2e-2)
    assert jnp.allclose(out2, ref2, rtol=2e-2, atol=2e-2)

    # Full-precision path: tight check of the kernel math itself.
    f1, f2 = lstm_block_forward(x, params, use_bf16=False)
    f1, f2 = jax.block_until_ready((f1, f2))
    assert jnp.allclose(f1, ref1, rtol=2e-3, atol=2e-3)
    assert jnp.allclose(f2, ref2, rtol=2e-3, atol=2e-3)

    print("KERNEL_OK")
</pallas_src>

<mosaic_0001>
module attributes {stable_mosaic.version = 11 : i64} {
  func.func @lstm_block_kernel(%arg0: i32, %arg1: i32, %arg2: memref<8x8x8xf32, #tpu.memory_space<vmem>>, %arg3: memref<8x128xbf16, #tpu.memory_space<vmem>>, %arg4: memref<32x128xbf16, #tpu.memory_space<vmem>>, %arg5: memref<1x128xf32, #tpu.memory_space<vmem>>, %arg6: memref<8x128xbf16, #tpu.memory_space<vmem>>, %arg7: memref<1x128xf32, #tpu.memory_space<vmem>>, %arg8: memref<64x128xbf16, #tpu.memory_space<vmem>>, %arg9: memref<1x128xf32, #tpu.memory_space<vmem>>, %arg10: memref<8x128xf32, #tpu.memory_space<vmem>>, %arg11: memref<8x8x128xf32, #tpu.memory_space<vmem>>, %arg12: memref<8x32xf32, #tpu.memory_space<vmem>>, %arg13: memref<8x32xf32, #tpu.memory_space<vmem>>) attributes {dimension_semantics = [#tpu.dimension_semantics<parallel>, #tpu.dimension_semantics<arbitrary>], iteration_bounds = array<i64: 1, 1>, scalar_prefetch = 0 : i64, scratch_operands = 3 : i64, tpu.core_type = #tpu.core_type<tc>, window_params = [{transform_indices = @transform_0, window_bounds = array<i64: 8, 8, 8>}, {pipeline_mode = #tpu.pipeline_mode<synchronous>, transform_indices = @transform_1, window_bounds = array<i64: 8, 128>}, {pipeline_mode = #tpu.pipeline_mode<synchronous>, transform_indices = @transform_2, window_bounds = array<i64: 32, 128>}, {pipeline_mode = #tpu.pipeline_mode<synchronous>, transform_indices = @transform_3, window_bounds = array<i64: 1, 128>}, {pipeline_mode = #tpu.pipeline_mode<synchronous>, transform_indices = @transform_4, window_bounds = array<i64: 8, 128>}, {pipeline_mode = #tpu.pipeline_mode<synchronous>, transform_indices = @transform_5, window_bounds = array<i64: 1, 128>}, {pipeline_mode = #tpu.pipeline_mode<synchronous>, transform_indices = @transform_6, window_bounds = array<i64: 64, 128>}, {pipeline_mode = #tpu.pipeline_mode<synchronous>, transform_indices = @transform_7, window_bounds = array<i64: 1, 128>}, {transform_indices = @transform_8, window_bounds = array<i64: 8, 128>}]} {
    %c0_i32 = arith.constant 0 : i32
    %0 = arith.cmpi eq, %arg1, %c0_i32 : i32
    %1 = arith.extui %0 : i1 to i32
    %c0_i32_0 = arith.constant 0 : i32
    %2 = arith.cmpi ne, %1, %c0_i32_0 : i32
    scf.if %2 {
      %cst_71 = arith.constant 0.000000e+00 : f32
      %219 = vector.broadcast %cst_71 : f32 to vector<8x32xf32>
      %c0_72 = arith.constant 0 : index
      %c0_73 = arith.constant 0 : index
      %220 = vector.load %arg12[%c0_72, %c0_73] : memref<8x32xf32, #tpu.memory_space<vmem>>, vector<8x32xf32>
      tpu.vector_store %arg12[%c0_72, %c0_73], %219 {strides = array<i32>} : memref<8x32xf32, #tpu.memory_space<vmem>>, vector<8x32xf32>,
      %cst_74 = arith.constant 0.000000e+00 : f32
      %221 = vector.broadcast %cst_74 : f32 to vector<8x32xf32>
      %c0_75 = arith.constant 0 : index
      %c0_76 = arith.constant 0 : index
      %222 = vector.load %arg13[%c0_75, %c0_76] : memref<8x32xf32, #tpu.memory_space<vmem>>, vector<8x32xf32>
      tpu.vector_store %arg13[%c0_75, %c0_76], %221 {strides = array<i32>} : memref<8x32xf32, #tpu.memory_space<vmem>>, vector<8x32xf32>,
    } else {
    }
    %c0 = arith.constant 0 : index
    %c0_1 = arith.constant 0 : index
    %c0_2 = arith.constant 0 : index
    %3 = vector.load %arg2[%c0, %c0_1, %c0_2] : memref<8x8x8xf32, #tpu.memory_space<vmem>>, vector<8x8x8xf32>
    %4 = vector.shape_cast %3 : vector<8x8x8xf32> to vector<64x8xf32>
    %5 = arith.truncf %4 : vector<64x8xf32> to vector<64x8xbf16>
    %c0_3 = arith.constant 0 : index
    %c0_4 = arith.constant 0 : index
    %6 = vector.load %arg3[%c0_3, %c0_4] : memref<8x128xbf16, #tpu.memory_space<vmem>>, vector<8x128xbf16>
    %cst = arith.constant dense<0.000000e+00> : vector<64x128xf32>
    %7 = tpu.matmul %5, %6, %cst {dimension_numbers = #tpu.dot_dimension_numbers<[1], [0], [0], [1], [0, 0, 1, 1], [], []>} : vector<64x8xbf16>, vector<8x128xbf16>, vector<64x128xf32> -> vector<64x128xf32>
    %c0_5 = arith.constant 0 : index
    %c0_6 = arith.constant 0 : index
    %8 = vector.load %arg5[%c0_5, %c0_6] : memref<1x128xf32, #tpu.memory_space<vmem>>, vector<1x128xf32>
    %9 = vector.broadcast %8 : vector<1x128xf32> to vector<64x128xf32>
    %10 = arith.addf %7, %9 : vector<64x128xf32>
    %11 = vector.shape_cast %10 : vector<64x128xf32> to vector<8x8x128xf32>
    %c0_7 = arith.constant 0 : index
    %c0_8 = arith.constant 0 : index
    %c0_9 = arith.constant 0 : index
    %12 = vector.load %arg11[%c0_7, %c0_8, %c0_9] : memref<8x8x128xf32, #tpu.memory_space<vmem>>, vector<8x8x128xf32>
    tpu.vector_store %arg11[%c0_7, %c0_8, %c0_9], %11 {strides = array<i32>} : memref<8x8x128xf32, #tpu.memory_space<vmem>>, vector<8x8x128xf32>,
    %13 = tpu.iota {dimensions = array<i32: 1>} : vector<8x128xi32>
    %c64_i32 = arith.constant 64 : i32
    %14 = vector.broadcast %c64_i32 : i32 to vector<8x128xi32>
    %15 = arith.cmpi sge, %13, %14 : vector<8x128xi32>
    %c96_i32 = arith.constant 96 : i32
    %16 = vector.broadcast %c96_i32 : i32 to vector<8x128xi32>
    %17 = arith.cmpi slt, %13, %16 : vector<8x128xi32>
    %18 = arith.andi %15, %17 : vector<8x128xi1>
    %c0_10 = arith.constant 0 : index
    %c0_11 = arith.constant 0 : index
    %19 = vector.load %arg4[%c0_10, %c0_11] : memref<32x128xbf16, #tpu.memory_space<vmem>>, vector<32x128xbf16>
    %c0_12 = arith.constant 0 : index
    %c0_13 = arith.constant 0 : index
    %20 = vector.load %arg12[%c0_12, %c0_13] : memref<8x32xf32, #tpu.memory_space<vmem>>, vector<8x32xf32>
    %c0_14 = arith.constant 0 : index
    %c0_15 = arith.constant 0 : index
    %21 = vector.load %arg13[%c0_14, %c0_15] : memref<8x32xf32, #tpu.memory_space<vmem>>, vector<8x32xf32>
    %c0_i32_16 = arith.constant 0 : i32
    %22 = arith.index_cast %c0_i32_16 : i32 to index
    %c0_17 = arith.constant 0 : index
    %c0_18 = arith.constant 0 : index
    %23 = vector.load %arg11[%22, %c0_17, %c0_18] : memref<8x8x128xf32, #tpu.memory_space<vmem>>, vector<1x8x128xf32>
    %24 = vector.shape_cast %23 : vector<1x8x128xf32> to vector<8x128xf32>
    %25 = arith.truncf %20 : vector<8x32xf32> to vector<8x32xbf16>
    %cst_19 = arith.constant dense<0.000000e+00> : vector<8x128xf32>
    %26 = tpu.matmul %25, %19, %cst_19 {dimension_numbers = #tpu.dot_dimension_numbers<[1], [0], [0], [1], [0, 0, 1, 1], [], []>} : vector<8x32xbf16>, vector<32x128xbf16>, vector<8x128xf32> -> vector<8x128xf32>
    %27 = arith.addf %24, %26 : vector<8x128xf32>
    %cst_20 = arith.constant 5.000000e-01 : f32
    %28 = vector.broadcast %cst_20 : f32 to vector<8x128xf32>
    %29 = arith.mulf %28, %27 : vector<8x128xf32>
    %30 = arith.select %18, %27, %29 : vector<8x128xi1>, vector<8x128xf32>
    %31 = math.tanh %30 : vector<8x128xf32>
    %cst_21 = arith.constant 5.000000e-01 : f32
    %32 = vector.broadcast %cst_21 : f32 to vector<8x128xf32>
    %33 = arith.mulf %32, %31 : vector<8x128xf32>
    %cst_22 = arith.constant 5.000000e-01 : f32
    %34 = vector.broadcast %cst_22 : f32 to vector<8x128xf32>
    %35 = arith.addf %33, %34 : vector<8x128xf32>
    %36 = arith.select %18, %31, %35 : vector<8x128xi1>, vector<8x128xf32>
    %37 = vector.extract_strided_slice %36 {offsets = [0, 0], sizes = [8, 32], strides = [1, 1]} : vector<8x128xf32> to vector<8x32xf32>
    %38 = vector.extract_strided_slice %36 {offsets = [0, 32], sizes = [8, 32], strides = [1, 1]} : vector<8x128xf32> to vector<8x32xf32>
    %39 = vector.extract_strided_slice %36 {offsets = [0, 64], sizes = [8, 32], strides = [1, 1]} : vector<8x128xf32> to vector<8x32xf32>
    %40 = vector.extract_strided_slice %36 {offsets = [0, 96], sizes = [8, 32], strides = [1, 1]} : vector<8x128xf32> to vector<8x32xf32>
    %41 = arith.mulf %38, %21 : vector<8x32xf32>
    %42 = arith.mulf %37, %39 : vector<8x32xf32>
    %43 = arith.addf %41, %42 : vector<8x32xf32>
    %44 = math.tanh %43 : vector<8x32xf32>
    %45 = arith.mulf %40, %44 : vector<8x32xf32>
    %c1_i32 = arith.constant 1 : i32
    %46 = arith.index_cast %c1_i32 : i32 to index
    %c0_23 = arith.constant 0 : index
    %c0_24 = arith.constant 0 : index
    %47 = vector.load %arg11[%46, %c0_23, %c0_24] : memref<8x8x128xf32, #tpu.memory_space<vmem>>, vector<1x8x128xf32>
    %48 = vector.shape_cast %47 : vector<1x8x128xf32> to vector<8x128xf32>
    %49 = arith.truncf %45 : vector<8x32xf32> to vector<8x32xbf16>
    %cst_25 = arith.constant dense<0.000000e+00> : vector<8x128xf32>
    %50 = tpu.matmul %49, %19, %cst_25 {dimension_numbers = #tpu.dot_dimension_numbers<[1], [0], [0], [1], [0, 0, 1, 1], [], []>} : vector<8x32xbf16>, vector<32x128xbf16>, vector<8x128xf32> -> vector<8x128xf32>
    %51 = arith.addf %48, %50 : vector<8x128xf32>
    %cst_26 = arith.constant 5.000000e-01 : f32
    %52 = vector.broadcast %cst_26 : f32 to vector<8x128xf32>
    %53 = arith.mulf %52, %51 : vector<8x128xf32>
    %54 = arith.select %18, %51, %53 : vector<8x128xi1>, vector<8x128xf32>
    %55 = math.tanh %54 : vector<8x128xf32>
    %cst_27 = arith.constant 5.000000e-01 : f32
    %56 = vector.broadcast %cst_27 : f32 to vector<8x128xf32>
    %57 = arith.mulf %56, %55 : vector<8x128xf32>
    %cst_28 = arith.constant 5.000000e-01 : f32
    %58 = vector.broadcast %cst_28 : f32 to vector<8x128xf32>
    %59 = arith.addf %57, %58 : vector<8x128xf32>
    %60 = arith.select %18, %55, %59 : vector<8x128xi1>, vector<8x128xf32>
    %61 = vector.extract_strided_slice %60 {offsets = [0, 0], sizes = [8, 32], strides = [1, 1]} : vector<8x128xf32> to vector<8x32xf32>
    %62 = vector.extract_strided_slice %60 {offsets = [0, 32], sizes = [8, 32], strides = [1, 1]} : vector<8x128xf32> to vector<8x32xf32>
    %63 = vector.extract_strided_slice %60 {offsets = [0, 64], sizes = [8, 32], strides = [1, 1]} : vector<8x128xf32> to vector<8x32xf32>
    %64 = vector.extract_strided_slice %60 {offsets = [0, 96], sizes = [8, 32], strides = [1, 1]} : vector<8x128xf32> to vector<8x32xf32>
    %65 = arith.mulf %62, %43 : vector<8x32xf32>
    %66 = arith.mulf %61, %63 : vector<8x32xf32>
    %67 = arith.addf %65, %66 : vector<8x32xf32>
    %68 = math.tanh %67 : vector<8x32xf32>
    %69 = arith.mulf %64, %68 : vector<8x32xf32>
    %c2_i32 = arith.constant 2 : i32
    %70 = arith.index_cast %c2_i32 : i32 to index
    %c0_29 = arith.constant 0 : index
    %c0_30 = arith.constant 0 : index
    %71 = vector.load %arg11[%70, %c0_29, %c0_30] : memref<8x8x128xf32, #tpu.memory_space<vmem>>, vector<1x8x128xf32>
    %72 = vector.shape_cast %71 : vector<1x8x128xf32> to vector<8x128xf32>
    %73 = arith.truncf %69 : vector<8x32xf32> to vector<8x32xbf16>
    %cst_31 = arith.constant dense<0.000000e+00> : vector<8x128xf32>
    %74 = tpu.matmul %73, %19, %cst_31 {dimension_numbers = #tpu.dot_dimension_numbers<[1], [0], [0], [1], [0, 0, 1, 1], [], []>} : vector<8x32xbf16>, vector<32x128xbf16>, vector<8x128xf32> -> vector<8x128xf32>
    %75 = arith.addf %72, %74 : vector<8x128xf32>
    %cst_32 = arith.constant 5.000000e-01 : f32
    %76 = vector.broadcast %cst_32 : f32 to vector<8x128xf32>
    %77 = arith.mulf %76, %75 : vector<8x128xf32>
    %78 = arith.select %18, %75, %77 : vector<8x128xi1>, vector<8x128xf32>
    %79 = math.tanh %78 : vector<8x128xf32>
    %cst_33 = arith.constant 5.000000e-01 : f32
    %80 = vector.broadcast %cst_33 : f32 to vector<8x128xf32>
    %81 = arith.mulf %80, %79 : vector<8x128xf32>
    %cst_34 = arith.constant 5.000000e-01 : f32
    %82 = vector.broadcast %cst_34 : f32 to vector<8x128xf32>
    %83 = arith.addf %81, %82 : vector<8x128xf32>
    %84 = arith.select %18, %79, %83 : vector<8x128xi1>, vector<8x128xf32>
    %85 = vector.extract_strided_slice %84 {offsets = [0, 0], sizes = [8, 32], strides = [1, 1]} : vector<8x128xf32> to vector<8x32xf32>
    %86 = vector.extract_strided_slice %84 {offsets = [0, 32], sizes = [8, 32], strides = [1, 1]} : vector<8x128xf32> to vector<8x32xf32>
    %87 = vector.extract_strided_slice %84 {offsets = [0, 64], sizes = [8, 32], strides = [1, 1]} : vector<8x128xf32> to vector<8x32xf32>
    %88 = vector.extract_strided_slice %84 {offsets = [0, 96], sizes = [8, 32], strides = [1, 1]} : vector<8x128xf32> to vector<8x32xf32>
    %89 = arith.mulf %86, %67 : vector<8x32xf32>
    %90 = arith.mulf %85, %87 : vector<8x32xf32>
    %91 = arith.addf %89, %90 : vector<8x32xf32>
    %92 = math.tanh %91 : vector<8x32xf32>
    %93 = arith.mulf %88, %92 : vector<8x32xf32>
    %c3_i32 = arith.constant 3 : i32
    %94 = arith.index_cast %c3_i32 : i32 to index
    %c0_35 = arith.constant 0 : index
    %c0_36 = arith.constant 0 : index
    %95 = vector.load %arg11[%94, %c0_35, %c0_36] : memref<8x8x128xf32, #tpu.memory_space<vmem>>, vector<1x8x128xf32>
    %96 = vector.shape_cast %95 : vector<1x8x128xf32> to vector<8x128xf32>
    %97 = arith.truncf %93 : vector<8x32xf32> to vector<8x32xbf16>
    %cst_37 = arith.constant dense<0.000000e+00> : vector<8x128xf32>
    %98 = tpu.matmul %97, %19, %cst_37 {dimension_numbers = #tpu.dot_dimension_numbers<[1], [0], [0], [1], [0, 0, 1, 1], [], []>} : vector<8x32xbf16>, vector<32x128xbf16>, vector<8x128xf32> -> vector<8x128xf32>
    %99 = arith.addf %96, %98 : vector<8x128xf32>
    %cst_38 = arith.constant 5.000000e-01 : f32
    %100 = vector.broadcast %cst_38 : f32 to vector<8x128xf32>
    %101 = arith.mulf %100, %99 : vector<8x128xf32>
    %102 = arith.select %18, %99, %101 : vector<8x128xi1>, vector<8x128xf32>
    %103 = math.tanh %102 : vector<8x128xf32>
    %cst_39 = arith.constant 5.000000e-01 : f32
    %104 = vector.broadcast %cst_39 : f32 to vector<8x128xf32>
    %105 = arith.mulf %104, %103 : vector<8x128xf32>
    %cst_40 = arith.constant 5.000000e-01 : f32
    %106 = vector.broadcast %cst_40 : f32 to vector<8x128xf32>
    %107 = arith.addf %105, %106 : vector<8x128xf32>
    %108 = arith.select %18, %103, %107 : vector<8x128xi1>, vector<8x128xf32>
    %109 = vector.extract_strided_slice %108 {offsets = [0, 0], sizes = [8, 32], strides = [1, 1]} : vector<8x128xf32> to vector<8x32xf32>
    %110 = vector.extract_strided_slice %108 {offsets = [0, 32], sizes = [8, 32], strides = [1, 1]} : vector<8x128xf32> to vector<8x32xf32>
    %111 = vector.extract_strided_slice %108 {offsets = [0, 64], sizes = [8, 32], strides = [1, 1]} : vector<8x128xf32> to vector<8x32xf32>
    %112 = vector.extract_strided_slice %108 {offsets = [0, 96], sizes = [8, 32], strides = [1, 1]} : vector<8x128xf32> to vector<8x32xf32>
    %113 = arith.mulf %110, %91 : vector<8x32xf32>
    %114 = arith.mulf %109, %111 : vector<8x32xf32>
    %115 = arith.addf %113, %114 : vector<8x32xf32>
    %116 = math.tanh %115 : vector<8x32xf32>
    %117 = arith.mulf %112, %116 : vector<8x32xf32>
    %c4_i32 = arith.constant 4 : i32
    %118 = arith.index_cast %c4_i32 : i32 to index
    %c0_41 = arith.constant 0 : index
    %c0_42 = arith.constant 0 : index
    %119 = vector.load %arg11[%118, %c0_41, %c0_42] : memref<8x8x128xf32, #tpu.memory_space<vmem>>, vector<1x8x128xf32>
    %120 = vector.shape_cast %119 : vector<1x8x128xf32> to vector<8x128xf32>
    %121 = arith.truncf %117 : vector<8x32xf32> to vector<8x32xbf16>
    %cst_43 = arith.constant dense<0.000000e+00> : vector<8x128xf32>
    %122 = tpu.matmul %121, %19, %cst_43 {dimension_numbers = #tpu.dot_dimension_numbers<[1], [0], [0], [1], [0, 0, 1, 1], [], []>} : vector<8x32xbf16>, vector<32x128xbf16>, vector<8x128xf32> -> vector<8x128xf32>
    %123 = arith.addf %120, %122 : vector<8x128xf32>
    %cst_44 = arith.constant 5.000000e-01 : f32
    %124 = vector.broadcast %cst_44 : f32 to vector<8x128xf32>
    %125 = arith.mulf %124, %123 : vector<8x128xf32>
    %126 = arith.select %18, %123, %125 : vector<8x128xi1>, vector<8x128xf32>
    %127 = math.tanh %126 : vector<8x128xf32>
    %cst_45 = arith.constant 5.000000e-01 : f32
    %128 = vector.broadcast %cst_45 : f32 to vector<8x128xf32>
    %129 = arith.mulf %128, %127 : vector<8x128xf32>
    %cst_46 = arith.constant 5.000000e-01 : f32
    %130 = vector.broadcast %cst_46 : f32 to vector<8x128xf32>
    %131 = arith.addf %129, %130 : vector<8x128xf32>
    %132 = arith.select %18, %127, %131 : vector<8x128xi1>, vector<8x128xf32>
    %133 = vector.extract_strided_slice %132 {offsets = [0, 0], sizes = [8, 32], strides = [1, 1]} : vector<8x128xf32> to vector<8x32xf32>
    %134 = vector.extract_strided_slice %132 {offsets = [0, 32], sizes = [8, 32], strides = [1, 1]} : vector<8x128xf32> to vector<8x32xf32>
    %135 = vector.extract_strided_slice %132 {offsets = [0, 64], sizes = [8, 32], strides = [1, 1]} : vector<8x128xf32> to vector<8x32xf32>
    %136 = vector.extract_strided_slice %132 {offsets = [0, 96], sizes = [8, 32], strides = [1, 1]} : vector<8x128xf32> to vector<8x32xf32>
    %137 = arith.mulf %134, %115 : vector<8x32xf32>
    %138 = arith.mulf %133, %135 : vector<8x32xf32>
    %139 = arith.addf %137, %138 : vector<8x32xf32>
    %140 = math.tanh %139 : vector<8x32xf32>
    %141 = arith.mulf %136, %140 : vector<8x32xf32>
    %c5_i32 = arith.constant 5 : i32
    %142 = arith.index_cast %c5_i32 : i32 to index
    %c0_47 = arith.constant 0 : index
    %c0_48 = arith.constant 0 : index
    %143 = vector.load %arg11[%142, %c0_47, %c0_48] : memref<8x8x128xf32, #tpu.memory_space<vmem>>, vector<1x8x128xf32>
    %144 = vector.shape_cast %143 : vector<1x8x128xf32> to vector<8x128xf32>
    %145 = arith.truncf %141 : vector<8x32xf32> to vector<8x32xbf16>
    %cst_49 = arith.constant dense<0.000000e+00> : vector<8x128xf32>
    %146 = tpu.matmul %145, %19, %cst_49 {dimension_numbers = #tpu.dot_dimension_numbers<[1], [0], [0], [1], [0, 0, 1, 1], [], []>} : vector<8x32xbf16>, vector<32x128xbf16>, vector<8x128xf32> -> vector<8x128xf32>
    %147 = arith.addf %144, %146 : vector<8x128xf32>
    %cst_50 = arith.constant 5.000000e-01 : f32
    %148 = vector.broadcast %cst_50 : f32 to vector<8x128xf32>
    %149 = arith.mulf %148, %147 : vector<8x128xf32>
    %150 = arith.select %18, %147, %149 : vector<8x128xi1>, vector<8x128xf32>
    %151 = math.tanh %150 : vector<8x128xf32>
    %cst_51 = arith.constant 5.000000e-01 : f32
    %152 = vector.broadcast %cst_51 : f32 to vector<8x128xf32>
    %153 = arith.mulf %152, %151 : vector<8x128xf32>
    %cst_52 = arith.constant 5.000000e-01 : f32
    %154 = vector.broadcast %cst_52 : f32 to vector<8x128xf32>
    %155 = arith.addf %153, %154 : vector<8x128xf32>
    %156 = arith.select %18, %151, %155 : vector<8x128xi1>, vector<8x128xf32>
    %157 = vector.extract_strided_slice %156 {offsets = [0, 0], sizes = [8, 32], strides = [1, 1]} : vector<8x128xf32> to vector<8x32xf32>
    %158 = vector.extract_strided_slice %156 {offsets = [0, 32], sizes = [8, 32], strides = [1, 1]} : vector<8x128xf32> to vector<8x32xf32>
    %159 = vector.extract_strided_slice %156 {offsets = [0, 64], sizes = [8, 32], strides = [1, 1]} : vector<8x128xf32> to vector<8x32xf32>
    %160 = vector.extract_strided_slice %156 {offsets = [0, 96], sizes = [8, 32], strides = [1, 1]} : vector<8x128xf32> to vector<8x32xf32>
    %161 = arith.mulf %158, %139 : vector<8x32xf32>
    %162 = arith.mulf %157, %159 : vector<8x32xf32>
    %163 = arith.addf %161, %162 : vector<8x32xf32>
    %164 = math.tanh %163 : vector<8x32xf32>
    %165 = arith.mulf %160, %164 : vector<8x32xf32>
    %c6_i32 = arith.constant 6 : i32
    %166 = arith.index_cast %c6_i32 : i32 to index
    %c0_53 = arith.constant 0 : index
    %c0_54 = arith.constant 0 : index
    %167 = vector.load %arg11[%166, %c0_53, %c0_54] : memref<8x8x128xf32, #tpu.memory_space<vmem>>, vector<1x8x128xf32>
    %168 = vector.shape_cast %167 : vector<1x8x128xf32> to vector<8x128xf32>
    %169 = arith.truncf %165 : vector<8x32xf32> to vector<8x32xbf16>
    %cst_55 = arith.constant dense<0.000000e+00> : vector<8x128xf32>
    %170 = tpu.matmul %169, %19, %cst_55 {dimension_numbers = #tpu.dot_dimension_numbers<[1], [0], [0], [1], [0, 0, 1, 1], [], []>} : vector<8x32xbf16>, vector<32x128xbf16>, vector<8x128xf32> -> vector<8x128xf32>
    %171 = arith.addf %168, %170 : vector<8x128xf32>
    %cst_56 = arith.constant 5.000000e-01 : f32
    %172 = vector.broadcast %cst_56 : f32 to vector<8x128xf32>
    %173 = arith.mulf %172, %171 : vector<8x128xf32>
    %174 = arith.select %18, %171, %173 : vector<8x128xi1>, vector<8x128xf32>
    %175 = math.tanh %174 : vector<8x128xf32>
    %cst_57 = arith.constant 5.000000e-01 : f32
    %176 = vector.broadcast %cst_57 : f32 to vector<8x128xf32>
    %177 = arith.mulf %176, %175 : vector<8x128xf32>
    %cst_58 = arith.constant 5.000000e-01 : f32
    %178 = vector.broadcast %cst_58 : f32 to vector<8x128xf32>
    %179 = arith.addf %177, %178 : vector<8x128xf32>
    %180 = arith.select %18, %175, %179 : vector<8x128xi1>, vector<8x128xf32>
    %181 = vector.extract_strided_slice %180 {offsets = [0, 0], sizes = [8, 32], strides = [1, 1]} : vector<8x128xf32> to vector<8x32xf32>
    %182 = vector.extract_strided_slice %180 {offsets = [0, 32], sizes = [8, 32], strides = [1, 1]} : vector<8x128xf32> to vector<8x32xf32>
    %183 = vector.extract_strided_slice %180 {offsets = [0, 64], sizes = [8, 32], strides = [1, 1]} : vector<8x128xf32> to vector<8x32xf32>
    %184 = vector.extract_strided_slice %180 {offsets = [0, 96], sizes = [8, 32], strides = [1, 1]} : vector<8x128xf32> to vector<8x32xf32>
    %185 = arith.mulf %182, %163 : vector<8x32xf32>
    %186 = arith.mulf %181, %183 : vector<8x32xf32>
    %187 = arith.addf %185, %186 : vector<8x32xf32>
    %188 = math.tanh %187 : vector<8x32xf32>
    %189 = arith.mulf %184, %188 : vector<8x32xf32>
    %c7_i32 = arith.constant 7 : i32
    %190 = arith.index_cast %c7_i32 : i32 to index
    %c0_59 = arith.constant 0 : index
    %c0_60 = arith.constant 0 : index
    %191 = vector.load %arg11[%190, %c0_59, %c0_60] : memref<8x8x128xf32, #tpu.memory_space<vmem>>, vector<1x8x128xf32>
    %192 = vector.shape_cast %191 : vector<1x8x128xf32> to vector<8x128xf32>
    %193 = arith.truncf %189 : vector<8x32xf32> to vector<8x32xbf16>
    %cst_61 = arith.constant dense<0.000000e+00> : vector<8x128xf32>
    %194 = tpu.matmul %193, %19, %cst_61 {dimension_numbers = #tpu.dot_dimension_numbers<[1], [0], [0], [1], [0, 0, 1, 1], [], []>} : vector<8x32xbf16>, vector<32x128xbf16>, vector<8x128xf32> -> vector<8x128xf32>
    %195 = arith.addf %192, %194 : vector<8x128xf32>
    %cst_62 = arith.constant 5.000000e-01 : f32
    %196 = vector.broadcast %cst_62 : f32 to vector<8x128xf32>
    %197 = arith.mulf %196, %195 : vector<8x128xf32>
    %198 = arith.select %18, %195, %197 : vector<8x128xi1>, vector<8x128xf32>
    %199 = math.tanh %198 : vector<8x128xf32>
    %cst_63 = arith.constant 5.000000e-01 : f32
    %200 = vector.broadcast %cst_63 : f32 to vector<8x128xf32>
    %201 = arith.mulf %200, %199 : vector<8x128xf32>
    %cst_64 = arith.constant 5.000000e-01 : f32
    %202 = vector.broadcast %cst_64 : f32 to vector<8x128xf32>
    %203 = arith.addf %201, %202 : vector<8x128xf32>
    %204 = arith.select %18, %199, %203 : vector<8x128xi1>, vector<8x128xf32>
    %205 = vector.extract_strided_slice %204 {offsets = [0, 0], sizes = [8, 32], strides = [1, 1]} : vector<8x128xf32> to vector<8x32xf32>
    %206 = vector.extract_strided_slice %204 {offsets = [0, 32], sizes = [8, 32], strides = [1, 1]} : vector<8x128xf32> to vector<8x32xf32>
    %207 = vector.extract_strided_slice %204 {offsets = [0, 64], sizes = [8, 32], strides = [1, 1]} : vector<8x128xf32> to vector<8x32xf32>
    %208 = vector.extract_strided_slice %204 {offsets = [0, 96], sizes = [8, 32], strides = [1, 1]} : vector<8x128xf32> to vector<8x32xf32>
    %209 = arith.mulf %206, %187 : vector<8x32xf32>
    %210 = arith.mulf %205, %207 : vector<8x32xf32>
    %211 = arith.addf %209, %210 : vector<8x32xf32>
    %212 = math.tanh %211 : vector<8x32xf32>
    %213 = arith.mulf %208, %212 : vector<8x32xf32>
    %c8_i32 = arith.constant 8 : i32
    %c0_65 = arith.constant 0 : index
    %c0_66 = arith.constant 0 : index
    %214 = vector.load %arg12[%c0_65, %c0_66] : memref<8x32xf32, #tpu.memory_space<vmem>>, vector<8x32xf32>
    tpu.vector_store %arg12[%c0_65, %c0_66], %213 {strides = array<i32>} : memref<8x32xf32, #tpu.memory_space<vmem>>, vector<8x32xf32>,
    %c0_67 = arith.constant 0 : index
    %c0_68 = arith.constant 0 : index
    %215 = vector.load %arg13[%c0_67, %c0_68] : memref<8x32xf32, #tpu.memory_space<vmem>>, vector<8x32xf32>
    tpu.vector_store %arg13[%c0_67, %c0_68], %211 {strides = array<i32>} : memref<8x32xf32, #tpu.memory_space<vmem>>, vector<8x32xf32>,
    %c0_i32_69 = arith.constant 0 : i32
    %216 = arith.cmpi eq, %arg1, %c0_i32_69 : i32
    %217 = arith.extui %216 : i1 to i32
    %c0_i32_70 = arith.constant 0 : i32
    %218 = arith.cmpi ne, %217, %c0_i32_70 : i32
    scf.if %218 {
      %c7 = arith.constant 7 : index
      %c0_71 = arith.constant 0 : index
      %c0_72 = arith.constant 0 : index
      %219 = vector.load %arg2[%c7, %c0_71, %c0_72] : memref<8x8x8xf32, #tpu.memory_space<vmem>>, vector<1x8x8xf32>
      %220 = vector.shape_cast %219 : vector<1x8x8xf32> to vector<8x8xf32>
      %221 = arith.truncf %220 : vector<8x8xf32> to vector<8x8xbf16>
      %c0_73 = arith.constant 0 : index
      %c0_74 = arith.constant 0 : index
      %222 = vector.load %arg6[%c0_73, %c0_74] : memref<8x128xbf16, #tpu.memory_space<vmem>>, vector<8x128xbf16>
      %cst_75 = arith.constant dense<0.000000e+00> : vector<8x128xf32>
      %223 = tpu.matmul %221, %222, %cst_75 {dimension_numbers = #tpu.dot_dimension_numbers<[1], [0], [0], [1], [0, 0, 1, 1], [], []>} : vector<8x8xbf16>, vector<8x128xbf16>, vector<8x128xf32> -> vector<8x128xf32>
      %c0_76 = arith.constant 0 : index
      %c0_77 = arith.constant 0 : index
      %224 = vector.load %arg7[%c0_76, %c0_77] : memref<1x128xf32, #tpu.memory_space<vmem>>, vector<1x128xf32>
      %225 = vector.broadcast %224 : vector<1x128xf32> to vector<8x128xf32>
      %226 = arith.addf %223, %225 : vector<8x128xf32>
      %cst_78 = arith.constant 5.000000e-01 : f32
      %227 = vector.broadcast %cst_78 : f32 to vector<8x128xf32>
      %228 = arith.mulf %227, %226 : vector<8x128xf32>
      %229 = arith.select %18, %226, %228 : vector<8x128xi1>, vector<8x128xf32>
      %230 = math.tanh %229 : vector<8x128xf32>
      %cst_79 = arith.constant 5.000000e-01 : f32
      %231 = vector.broadcast %cst_79 : f32 to vector<8x128xf32>
      %232 = arith.mulf %231, %230 : vector<8x128xf32>
      %cst_80 = arith.constant 5.000000e-01 : f32
      %233 = vector.broadcast %cst_80 : f32 to vector<8x128xf32>
      %234 = arith.addf %232, %233 : vector<8x128xf32>
      %235 = arith.select %18, %230, %234 : vector<8x128xi1>, vector<8x128xf32>
      %236 = vector.extract_strided_slice %235 {offsets = [0, 0], sizes = [8, 32], strides = [1, 1]} : vector<8x128xf32> to vector<8x32xf32>
      %237 = vector.extract_strided_slice %235 {offsets = [0, 64], sizes = [8, 32], strides = [1, 1]} : vector<8x128xf32> to vector<8x32xf32>
      %238 = arith.mulf %236, %237 : vector<8x32xf32>
      %239 = vector.extract_strided_slice %235 {offsets = [0, 96], sizes = [8, 32], strides = [1, 1]} : vector<8x128xf32> to vector<8x32xf32>
      %240 = math.tanh %238 : vector<8x32xf32>
      %241 = arith.mulf %239, %240 : vector<8x32xf32>
      %242 = tpu.concatenate %213, %241 in 1 : vector<8x32xf32>, vector<8x32xf32> -> vector<8x64xf32>
      %243 = arith.truncf %242 : vector<8x64xf32> to vector<8x64xbf16>
      %c0_81 = arith.constant 0 : index
      %c0_82 = arith.constant 0 : index
      %244 = vector.load %arg8[%c0_81, %c0_82] : memref<64x128xbf16, #tpu.memory_space<vmem>>, vector<64x128xbf16>
      %cst_83 = arith.constant dense<0.000000e+00> : vector<8x128xf32>
      %245 = tpu.matmul %243, %244, %cst_83 {dimension_numbers = #tpu.dot_dimension_numbers<[1], [0], [0], [1], [0, 0, 1, 1], [], []>} : vector<8x64xbf16>, vector<64x128xbf16>, vector<8x128xf32> -> vector<8x128xf32>
      %c0_84 = arith.constant 0 : index
      %c0_85 = arith.constant 0 : index
      %246 = vector.load %arg9[%c0_84, %c0_85] : memref<1x128xf32, #tpu.memory_space<vmem>>, vector<1x128xf32>
      %247 = vector.broadcast %246 : vector<1x128xf32> to vector<8x128xf32>
      %248 = arith.addf %245, %247 : vector<8x128xf32>
      %c0_86 = arith.constant 0 : index
      %c0_87 = arith.constant 0 : index
      %249 = vector.load %arg10[%c0_86, %c0_87] : memref<8x128xf32, #tpu.memory_space<vmem>>, vector<8x128xf32>
      tpu.vector_store %arg10[%c0_86, %c0_87], %248 {strides = array<i32>} : memref<8x128xf32, #tpu.memory_space<vmem>>, vector<8x128xf32>,
    } else {
    }
    return
  }
  func.func @transform_0(%arg0: i32, %arg1: i32) -> (i32, i32, i32) {
    %c0_i32 = arith.constant 0 : i32
    %c0_i32_0 = arith.constant 0 : i32
    return %arg1, %arg0, %c0_i32 : i32, i32, i32
  }
  func.func @transform_1(%arg0: i32, %arg1: i32) -> (i32, i32) {
    %c0_i32 = arith.constant 0 : i32
    %c0_i32_0 = arith.constant 0 : i32
    %c0_i32_1 = arith.constant 0 : i32
    return %c0_i32, %c0_i32_0 : i32, i32
  }
  func.func @transform_2(%arg0: i32, %arg1: i32) -> (i32, i32) {
    %c0_i32 = arith.constant 0 : i32
    %c0_i32_0 = arith.constant 0 : i32
    %c0_i32_1 = arith.constant 0 : i32
    return %c0_i32, %c0_i32_0 : i32, i32
  }
  func.func @transform_3(%arg0: i32, %arg1: i32) -> (i32, i32) {
    %c0_i32 = arith.constant 0 : i32
    %c0_i32_0 = arith.constant 0 : i32
    %c0_i32_1 = arith.constant 0 : i32
    return %c0_i32, %c0_i32_0 : i32, i32
  }
  func.func @transform_4(%arg0: i32, %arg1: i32) -> (i32, i32) {
    %c0_i32 = arith.constant 0 : i32
    %c0_i32_0 = arith.constant 0 : i32
    %c0_i32_1 = arith.constant 0 : i32
    return %c0_i32, %c0_i32_0 : i32, i32
  }
  func.func @transform_5(%arg0: i32, %arg1: i32) -> (i32, i32) {
    %c0_i32 = arith.constant 0 : i32
    %c0_i32_0 = arith.constant 0 : i32
    %c0_i32_1 = arith.constant 0 : i32
    return %c0_i32, %c0_i32_0 : i32, i32
  }
  func.func @transform_6(%arg0: i32, %arg1: i32) -> (i32, i32) {
    %c0_i32 = arith.constant 0 : i32
    %c0_i32_0 = arith.constant 0 : i32
    %c0_i32_1 = arith.constant 0 : i32
    return %c0_i32, %c0_i32_0 : i32, i32
  }
  func.func @transform_7(%arg0: i32, %arg1: i32) -> (i32, i32) {
    %c0_i32 = arith.constant 0 : i32
    %c0_i32_0 = arith.constant 0 : i32
    %c0_i32_1 = arith.constant 0 : i32
    return %c0_i32, %c0_i32_0 : i32, i32
  }
  func.func @transform_8(%arg0: i32, %arg1: i32) -> (i32, i32) {
    %c0_i32 = arith.constant 0 : i32
    %c0_i32_0 = arith.constant 0 : i32
    return %arg0, %c0_i32 : i32, i32
  }
}

</mosaic_0001>

<bundles_post_ra>
// kernel: tpu_custom_call.1
= control target key start
LH: loop header
LB: loop body
LE: loop exit
PB: predicated region body
PF: predicated region fallthrough
CT: control target
= control target key end

     0   :  { %13 = vsyncpa [#allocation6], 0  ;;  %s1163_s0 = inlined_call_operand.hbm [shape: f32[8,8,8], index: 0, kind: input, shape index: {}]   ;;  %s1164_s1 = inlined_call_operand.hbm [shape: bf16[8,128], index: 1, kind: input, shape index: {}]   ;;  %s1165_s2 = inlined_call_operand.hbm [shape: bf16[32,128], index: 2, kind: input, shape index: {}]   ;;  %s1166_s3 = inlined_call_operand.vmem [shape: f32[1,128], index: 3, kind: input, shape index: {}]   ;;  %s1167_s4 = inlined_call_operand.hbm [shape: bf16[8,128], index: 4, kind: input, shape index: {}]   ;;  %s1168_s5 = inlined_call_operand.vmem [shape: f32[1,128], index: 5, kind: input, shape index: {}]   ;;  %s1169_s6 = inlined_call_operand.hbm [shape: bf16[64,128], index: 6, kind: input, shape index: {}]   ;;  %s1170_s7 = inlined_call_operand.vmem [shape: f32[1,128], index: 7, kind: input, shape index: {}]   ;;  %s1171_s8 = inlined_call_operand.hbm [shape: f32[8,128], index: 8, kind: output, shape index: {}]  }
   0x1   :  { %14 = vsyncpa [#allocation9], 0 }
   0x2   :  { %15 = vsyncpa [#allocation12], 0  ;;  %s35_s29 = sshll.u32 %s1164_s1, 4  ;;  %s36_s29 = int_to_ptr.hbm [resolvable:$true] %s35_s29 }
   0x3   :  { %16 = vsyncpa [#allocation7], 0  ;;  %s959_s30 = smov [#allocation8]   ;;  %s61_s12 = sshll.u32 %s1167_s4, 4  ;;  %s62_s12 = int_to_ptr.hbm [resolvable:$true] %s61_s12 }
   0x4   :  { %s37_s9 = sshll.u32 %s959_s30, 4  ;;  %s960_s13 = smov [#allocation11]   ;;  %s38_s9 = int_to_ptr.vmem [resolvable:$true] %s37_s9 }
   0x5   :  { %40 = dma.hbm_to_vmem [thread:$0]  %s36_s29, 64, %s38_s9, [#allocation9]  }
   0x6   :  { %s63_s14 = sshll.u32 %s960_s13, 4  ;;  %s21_s17 = sshll.u32 %s1163_s0, 4  ;;  %s64_s14 = int_to_ptr.vmem [resolvable:$true] %s63_s14  ;;  %s22_s17 = int_to_ptr.hbm [resolvable:$true] %s21_s17 }
   0x7   :  { %66 = dma.hbm_to_vmem [thread:$0]  %s62_s12, 64, %s64_s14, [#allocation12]  }
   0x8   :  { %s961_s1 = smov [#allocation5]   ;;  %s45_s21 = sshll.u32 %s1165_s2, 4  ;;  %s46_s21 = int_to_ptr.hbm [resolvable:$true] %s45_s21 }
   0x9   :  { %s23_s18 = sshll.u32 %s961_s1, 4  ;;  %s962_s22 = smov 128   ;;  %s24_s18 = int_to_ptr.vmem [resolvable:$true] %s23_s18 }
   0xa   :  { %s963_s4 = smov 8   ;;  %s964_s23 = smov [#allocation10]  }
   0xb   :  { %29 = dma.hbm_to_vmem [thread:$0]  %s22_s17, 1024, %s24_s18, [#allocation6], %s962_s22, %s962_s22, %s963_s4  }
   0xc   :  { %s47_s24 = sshll.u32 %s964_s23, 4  ;;  %s965_s25 = smov 64   ;;  %s48_s24 = int_to_ptr.vmem [resolvable:$true] %s47_s24 }
   0xd   :  { %s966_s26 = smov 4   ;;  %s73_s28 = sshll.u32 %s1169_s6, 4  ;;  %s74_s28 = int_to_ptr.hbm [resolvable:$true] %s73_s28 }
   0xe   :  { %53 = dma.hbm_to_vmem [thread:$0]  %s46_s21, 256, %s48_s24, [#allocation9], %s965_s25, %s965_s25, %s966_s26  }
   0xf   :  { %s967_s29 = smov [#allocation13]  }
  0x10   :  { %s75_s30 = sshll.u32 %s967_s29, 4  ;;  %s76_s30 = int_to_ptr.vmem [resolvable:$true] %s75_s30 }
  0x11   :  { %81 = dma.hbm_to_vmem [thread:$0]  %s74_s28, 512, %s76_s30, [#allocation12], %s965_s25, %s965_s25, %s966_s26  }
  0x12   :  { %951 = dma.done.wait [#allocation6], 1024  }
  0x13   :  { %952 = vsyncadd [#allocation6], 4294966272 }
  0x14   :  { %953 = dma.done.wait [#allocation9], 320  }
  0x15   :  { %954 = vsyncadd [#allocation9], 4294966976 }
  0x16   :  { %955 = dma.done.wait [#allocation12], 576  }
  0x17   :  { %956 = vsyncadd [#allocation12], 4294966720  ;;  %vm109_vm0 = vcmask 261120   ;;  %v968_v0 = vmov 0.0   ;;  %vm142_vm1 = vcmask 1043456   ;;  %v1038_v2 = vld [vmem:[#allocation10 + $0x8] sm:$0xff]  ;;  %v183_v10 = vlaneseq }
  0x18   :  { %110 = vst.msk [vmem:[#allocation3] sm:$0xff] %vm109_vm0, %v968_v0  ;;  %v124_v1 = vld [vmem:[#allocation8] sm:$0xf]  ;;  %v113_v5 = vld [vmem:[#allocation5 + $0x8] sm:$0xff]  ;;  %218 = vmatpush.bf16.msra.mxu1 %v1038_v2  ;;  %vm129_vm2 = vcmask 64512   ;;  %268 = vmatpush.bf16.msra.mxu2 %v1038_v2  ;;  %v114_v54 = vld [vmem:[#allocation5 + $0x10] sm:$0xff] }
  0x19   :  { %111 = vst.msk [vmem:[#allocation4] sm:$0xff] %vm109_vm0, %v968_v0  ;;  %v144_v3 = vsel %vm142_vm1, %v124_v1, 0  ;;  %v112_v4 = vld [vmem:[#allocation5] sm:$0xff]  ;;  %314 = vmatpush.bf16.msra.mxu3 %v1038_v2  ;;  %v1053_v11 = vld [vmem:[%s1166_s3] ss:$0 sm:$0xff]  ;;  %v184_v12 = vand.u32 127, %v183_v10 }
  0x1a   :  { %153 = vmatpush.bf16.msra.mxu0 %v144_v3  ;;  %v120_v6 = vpack.c.bf16 %v113_v5, %v112_v4  ;;  %v749_v7 = vld [vmem:[#allocation10] sm:$0xff]  ;;  %s969_s3 = smov 32   ;;  %v115_v55 = vld [vmem:[#allocation5 + $0x18] sm:$0xff]  ;;  %v591_v60 = vld [vmem:[#allocation11] sm:$0xf]  ;;  %vm674_vm6 = vcmask 523264  }
  0x1b   :  { %vm185_vm3 = vcmp.ge.s32.totalorder %v184_v12, 64  ;;  %vm186_vm4 = vcmp.lt.s32.totalorder %v184_v12, 96  ;;  %v121_v56 = vpack.c.bf16 %v115_v55, %v114_v54  ;;  %v600_v61 = vsel %vm142_vm1, %v591_v60, 0  ;;  %s971_s13 = smov [#allocation14]   ;;  %s699_s17 = sshll.u32 %s1171_s8, 4  ;;  %s700_s17 = int_to_ptr.hbm [resolvable:$true] %s699_s17 }
  0x1c   :  { %219 = vmatpush.bf16.msra.mxu1 %v749_v7  ;;  %269 = vmatpush.bf16.msra.mxu2 %v749_v7  ;;  %vm1056_vm5 = vmand %vm185_vm3, %vm186_vm4  ;;  %s697_s14 = sshll.u32 %s971_s13, 4  ;;  %s698_s14 = int_to_ptr.vmem [resolvable:$true] %s697_s14 }
  0x1d   :  { %711 = vmatmul.msk.bf16.vlgmr.msra.gmra.mxu0 %vm129_vm2, %v120_v6  ;;  %315 = vmatpush.bf16.msra.mxu3 %v749_v7 }
  0x1f   :  { %v192_v8 = vld [vmem:[#allocation3] sm:$0xff] }
  0x20   :  { %v195_v9 = vpack.c.bf16 %v192_v8, %v192_v8  ;;  %360 = vmatpush.bf16.msrb.mxu1 %v1038_v2  ;;  %406 = vmatpush.bf16.msrb.mxu2 %v1038_v2  ;;  %v193_v25 = vld [vmem:[#allocation4] sm:$0xff] }
  0x21   :  { %452 = vmatpush.bf16.msrb.mxu3 %v1038_v2 }
  0x22   :  { %723 = vmatmul.msk.bf16.vlgmr.msra.gmra.mxu1 %vm109_vm0, %v195_v9 }
  0x24   :  { %361 = vmatpush.bf16.msrb.mxu1 %v749_v7  ;;  %407 = vmatpush.bf16.msrb.mxu2 %v749_v7 }
  0x25   :  { %453 = vmatpush.bf16.msrb.mxu3 %v749_v7 }
  0x28   :  { %498 = vmatpush.bf16.msra.mxu1 %v1038_v2 }
  0x2c   :  { %499 = vmatpush.bf16.msra.mxu1 %v749_v7 }
  0x2d   :  { %712 = vmatmul.msk.bf16.gmra.mxu0 %vm129_vm2, %v121_v56 }
  0x9a   :  { %v155_v13 = vpop.f32.mrf.mxu0 }
  0x9b   :  { %v156_v14 = vadd.f32 %v1053_v11, %v155_v13 }
  0x9f   :  { %v221_v15 = vpop.f32.mrf.mxu1 }
  0xa0   :  { %v225_v16 = vadd.f32 %v221_v15, %v156_v14 }
  0xa2   :  { %v226_v18 = vmul.f32 0.5, %v225_v16  ;;  %v157_v37 = vpop.f32.mrf.mxu0 }
  0xa3   :  { %v158_v38 = vadd.f32 %v1053_v11, %v157_v37 }
  0xa4   :  { %v227_v19 = vsel %vm1056_vm5, %v225_v16, %v226_v18 }
  0xa5   :  { %771 = vtanh.f32 %v227_v19 }
  0xa7   :  { %v223_v20 = vpop.f32.mrf.mxu1 }
  0xaa   :  { %v160_v63 = vpop.f32.mrf.mxu0 }
  0xab   :  { %v772_v21 = vpop.eup %771  ;;  %v161_v0 = vadd.f32 %v1053_v11, %v160_v63 }
  0xac   :  { %v229_v22 = vmul.f32 0.5, %v772_v21 }
  0xae   :  { %v230_v23 = vadd.f32 0.5, %v229_v22 }
  0xb0   :  { %v231_v24 = vsel %vm1056_vm5, %v772_v21, %v230_v23 }
  0xb1   :  { %238 = vrot.lane.b32.xlu0 %v231_v24, %s965_s25 }
  0xb2   :  { %v162_v22 = vpop.f32.mrf.mxu0 }
  0xb3   :  { %v163_v23 = vadd.f32 %v1053_v11, %v162_v22  ;;  %v118_v22 = vld [vmem:[#allocation5 + $0x30] sm:$0xff] }
  0xb9   :  { %233 = vrot.lane.b32.xlu0 %v193_v25, %s969_s3 }
 0x123   :  { %v239_v26 = vpop.permute.xlu0 %238 }
 0x124   :  { %v241_v27 = vmul.f32 %v239_v26, %v231_v24 }
 0x126   :  { %243 = vrot.lane.b32.xlu1 %v241_v27, %s969_s3 }
 0x12b   :  { %v234_v28 = vpop.permute.xlu0 %233 }
 0x12c   :  { %v236_v29 = vmul.f32 %v234_v28, %v231_v24 }
 0x198   :  { %v244_v30 = vpop.permute.xlu1 %243 }
 0x199   :  { %v246_v31 = vadd.f32 %v244_v30, %v236_v29 }
 0x19b   :  { %773 = vtanh.f32 %v246_v31 }
 0x1a1   :  { %v774_v32 = vpop.eup %773 }
 0x1a2   :  { %249 = vrot.lane.b32.xlu1 %v774_v32, %s965_s25 }
 0x214   :  { %v250_v33 = vpop.permute.xlu1 %249 }
 0x215   :  { %v252_v34 = vmul.f32 %v250_v33, %v231_v24 }
 0x217   :  { %v255_v35 = vpack.c.bf16 %v252_v34, %v252_v34 }
 0x219   :  { %257 = vrot.lane.b32.xlu2 %v255_v35, %s969_s3 }
 0x273   :  { %v258_v36 = vpop.permute.xlu2 %257 }
 0x274   :  { %724 = vmatmul.msk.bf16.vlgmr.msra.gmra.mxu2 %vm109_vm0, %v258_v36 }
 0x275   :  { %544 = vmatpush.bf16.msra.mxu2 %v1038_v2 }
 0x279   :  { %545 = vmatpush.bf16.msra.mxu2 %v749_v7 }
 0x2f7   :  { %v271_v39 = vpop.f32.mrf.mxu2 }
 0x2f8   :  { %v275_v40 = vadd.f32 %v271_v39, %v158_v38  ;;  %v116_v39 = vld [vmem:[#allocation5 + $0x20] sm:$0xff] }
 0x2fa   :  { %v276_v41 = vmul.f32 0.5, %v275_v40 }
 0x2fc   :  { %v277_v42 = vsel %vm1056_vm5, %v275_v40, %v276_v41  ;;  %v117_v40 = vld [vmem:[#allocation5 + $0x28] sm:$0xff] }
 0x2fd   :  { %775 = vtanh.f32 %v277_v42  ;;  %v122_v41 = vpack.c.bf16 %v117_v40, %v116_v39 }
 0x2ff   :  { %v273_v43 = vpop.f32.mrf.mxu2  ;;  %713 = vmatmul.msk.bf16.gmra.mxu0 %vm129_vm2, %v122_v41 }
 0x303   :  { %v776_v44 = vpop.eup %775 }
 0x304   :  { %v279_v45 = vmul.f32 0.5, %v776_v44 }
 0x306   :  { %v280_v46 = vadd.f32 0.5, %v279_v45 }
 0x308   :  { %v281_v47 = vsel %vm1056_vm5, %v776_v44, %v280_v46 }
 0x309   :  { %284 = vrot.lane.b32.xlu2 %v281_v47, %s965_s25  ;;  %v282_v50 = vmul.f32 %v281_v47, %v246_v31 }
 0x363   :  { %v285_v48 = vpop.permute.xlu2 %284 }
 0x364   :  { %v287_v49 = vmul.f32 %v285_v48, %v281_v47 }
 0x366   :  { %289 = vrot.lane.b32.xlu0 %v287_v49, %s969_s3 }
 0x37c   :  { %v165_v46 = vpop.f32.mrf.mxu0 }
 0x3d8   :  { %v290_v51 = vpop.permute.xlu0 %289 }
 0x3d9   :  { %v292_v52 = vadd.f32 %v290_v51, %v282_v50 }
 0x3db   :  { %777 = vtanh.f32 %v292_v52 }
 0x3e1   :  { %v778_v53 = vpop.eup %777 }
 0x3e2   :  { %295 = vrot.lane.b32.xlu1 %v778_v53, %s965_s25 }
 0x454   :  { %v296_v57 = vpop.permute.xlu1 %295 }
 0x455   :  { %v298_v58 = vmul.f32 %v296_v57, %v281_v47  ;;  %v166_v47 = vadd.f32 %v1053_v11, %v165_v46 }
 0x457   :  { %v301_v59 = vpack.c.bf16 %v298_v58, %v298_v58 }
 0x459   :  { %303 = vrot.lane.b32.xlu2 %v301_v59, %s969_s3 }
 0x4b3   :  { %v304_v62 = vpop.permute.xlu2 %303 }
 0x4b4   :  { %725 = vmatmul.msk.bf16.vlgmr.msra.gmra.mxu3 %vm109_vm0, %v304_v62 }
 0x4b5   :  { %609 = vmatpush.bf16.msra.mxu3 %v600_v61 }
 0x537   :  { %v317_v1 = vpop.f32.mrf.mxu3 }
 0x538   :  { %v321_v2 = vadd.f32 %v317_v1, %v161_v0 }
 0x53a   :  { %v322_v3 = vmul.f32 0.5, %v321_v2 }
 0x53c   :  { %v323_v4 = vsel %vm1056_vm5, %v321_v2, %v322_v3  ;;  %v167_v3 = vpop.f32.mrf.mxu0 }
 0x53d   :  { %779 = vtanh.f32 %v323_v4  ;;  %v168_v4 = vadd.f32 %v1053_v11, %v167_v3 }
 0x53f   :  { %v319_v5 = vpop.f32.mrf.mxu3 }
 0x543   :  { %v780_v6 = vpop.eup %779 }
 0x544   :  { %v325_v7 = vmul.f32 0.5, %v780_v6 }
 0x546   :  { %v326_v8 = vadd.f32 0.5, %v325_v7 }
 0x548   :  { %v327_v9 = vsel %vm1056_vm5, %v780_v6, %v326_v8 }
 0x549   :  { %330 = vrot.lane.b32.xlu0 %v327_v9, %s965_s25  ;;  %v328_v13 = vmul.f32 %v327_v9, %v292_v52 }
 0x5bb   :  { %v331_v10 = vpop.permute.xlu0 %330 }
 0x5bc   :  { %v333_v12 = vmul.f32 %v331_v10, %v327_v9 }
 0x5be   :  { %335 = vrot.lane.b32.xlu1 %v333_v12, %s969_s3 }
 0x630   :  { %v336_v14 = vpop.permute.xlu1 %335 }
 0x631   :  { %v338_v15 = vadd.f32 %v336_v14, %v328_v13 }
 0x633   :  { %781 = vtanh.f32 %v338_v15 }
 0x639   :  { %v782_v16 = vpop.eup %781 }
 0x63a   :  { %341 = vrot.lane.b32.xlu2 %v782_v16, %s965_s25 }
 0x694   :  { %v342_v18 = vpop.permute.xlu2 %341 }
 0x695   :  { %v344_v19 = vmul.f32 %v342_v18, %v327_v9 }
 0x697   :  { %v347_v20 = vpack.c.bf16 %v344_v19, %v344_v19 }
 0x699   :  { %349 = vrot.lane.b32.xlu0 %v347_v20, %s969_s3 }
 0x70b   :  { %v350_v21 = vpop.permute.xlu0 %349 }
 0x70c   :  { %726 = vmatmul.msk.bf16.vlgmr.msrb.gmra.mxu1 %vm109_vm0, %v350_v21 }
 0x789   :  { %v363_v24 = vpop.f32.mrf.mxu1 }
 0x78a   :  { %v367_v25 = vadd.f32 %v363_v24, %v163_v23  ;;  %v119_v23 = vld [vmem:[#allocation5 + $0x38] sm:$0xff] }
 0x78b   :  { %v123_v24 = vpack.c.bf16 %v119_v23, %v118_v22  ;;  %v590_v46 = vpack.c.bf16 %v119_v23, %v119_v23  ;;  %v751_v22 = vld [vmem:[#allocation13] sm:$0xff] }
 0x78c   :  { %v368_v26 = vmul.f32 0.5, %v367_v25 }
 0x78d   :  { %714 = vmatmul.msk.bf16.gmra.mxu0 %vm129_vm2, %v123_v24 }
 0x78e   :  { %v369_v27 = vsel %vm1056_vm5, %v367_v25, %v368_v26 }
 0x78f   :  { %783 = vtanh.f32 %v369_v27 }
 0x791   :  { %v365_v28 = vpop.f32.mrf.mxu1 }
 0x795   :  { %v784_v29 = vpop.eup %783 }
 0x796   :  { %v371_v30 = vmul.f32 0.5, %v784_v29 }
 0x798   :  { %v372_v31 = vadd.f32 0.5, %v371_v30 }
 0x79a   :  { %v373_v32 = vsel %vm1056_vm5, %v784_v29, %v372_v31 }
 0x79b   :  { %376 = vrot.lane.b32.xlu1 %v373_v32, %s965_s25  ;;  %v374_v35 = vmul.f32 %v373_v32, %v338_v15 }
 0x80a   :  { %v170_v29 = vpop.f32.mrf.mxu0 }
 0x80b   :  { %v171_v30 = vadd.f32 %v1053_v11, %v170_v29 }
 0x80d   :  { %v377_v33 = vpop.permute.xlu1 %376 }
 0x80e   :  { %v379_v34 = vmul.f32 %v377_v33, %v373_v32 }
 0x810   :  { %381 = vrot.lane.b32.xlu2 %v379_v34, %s969_s3 }
 0x86a   :  { %v382_v36 = vpop.permute.xlu2 %381 }
 0x86b   :  { %v384_v37 = vadd.f32 %v382_v36, %v374_v35 }
 0x86d   :  { %785 = vtanh.f32 %v384_v37 }
 0x873   :  { %v786_v38 = vpop.eup %785 }
 0x874   :  { %387 = vrot.lane.b32.xlu0 %v786_v38, %s965_s25 }
 0x8e6   :  { %v388_v42 = vpop.permute.xlu0 %387 }
 0x8e7   :  { %v390_v43 = vmul.f32 %v388_v42, %v373_v32 }
 0x8e9   :  { %v393_v44 = vpack.c.bf16 %v390_v43, %v390_v43 }
 0x8eb   :  { %395 = vrot.lane.b32.xlu1 %v393_v44, %s969_s3 }
 0x95d   :  { %v396_v45 = vpop.permute.xlu1 %395 }
 0x95e   :  { %727 = vmatmul.msk.bf16.vlgmr.msrb.gmra.mxu2 %vm109_vm0, %v396_v45 }
 0x9e1   :  { %v409_v48 = vpop.f32.mrf.mxu2 }
 0x9e2   :  { %v413_v49 = vadd.f32 %v409_v48, %v166_v47 }
 0x9e4   :  { %v414_v50 = vmul.f32 0.5, %v413_v49 }
 0x9e6   :  { %v415_v51 = vsel %vm1056_vm5, %v413_v49, %v414_v50  ;;  %v769_v50 = vld [vmem:[%s1168_s5] ss:$0 sm:$0xff]  ;;  %s970_s5 = smov 96  }
 0x9e7   :  { %787 = vtanh.f32 %v415_v51 }
 0x9e9   :  { %v411_v52 = vpop.f32.mrf.mxu2 }
 0x9ed   :  { %v788_v53 = vpop.eup %787 }
 0x9ee   :  { %v417_v54 = vmul.f32 0.5, %v788_v53 }
 0x9f0   :  { %v418_v55 = vadd.f32 0.5, %v417_v54 }
 0x9f2   :  { %v419_v56 = vsel %vm1056_vm5, %v788_v53, %v418_v55 }
 0x9f3   :  { %422 = vrot.lane.b32.xlu2 %v419_v56, %s965_s25  ;;  %v420_v59 = vmul.f32 %v419_v56, %v384_v37 }
 0xa4d   :  { %v423_v57 = vpop.permute.xlu2 %422 }
 0xa4e   :  { %v425_v58 = vmul.f32 %v423_v57, %v419_v56 }
 0xa50   :  { %427 = vrot.lane.b32.xlu0 %v425_v58, %s969_s3 }
 0xac2   :  { %v428_v60 = vpop.permute.xlu0 %427 }
 0xac3   :  { %v430_v61 = vadd.f32 %v428_v60, %v420_v59 }
 0xac5   :  { %789 = vtanh.f32 %v430_v61 }
 0xacb   :  { %v790_v62 = vpop.eup %789 }
 0xacc   :  { %433 = vrot.lane.b32.xlu1 %v790_v62, %s965_s25 }
 0xb3e   :  { %v434_v63 = vpop.permute.xlu1 %433 }
 0xb3f   :  { %v436_v0 = vmul.f32 %v434_v63, %v419_v56 }
 0xb41   :  { %v439_v1 = vpack.c.bf16 %v436_v0, %v436_v0 }
 0xb43   :  { %441 = vrot.lane.b32.xlu2 %v439_v1, %s969_s3 }
 0xb9d   :  { %v442_v2 = vpop.permute.xlu2 %441 }
 0xb9e   :  { %728 = vmatmul.msk.bf16.vlgmr.msrb.gmra.mxu3 %vm109_vm0, %v442_v2 }
 0xbae   :  { %731 = vmatmul.msk.bf16.vlgmr.msra.gmra.mxu3 %vm129_vm2, %v590_v46 }
 0xc21   :  { %v455_v5 = vpop.f32.mrf.mxu3 }
 0xc22   :  { %v459_v6 = vadd.f32 %v455_v5, %v168_v4 }
 0xc24   :  { %v460_v7 = vmul.f32 0.5, %v459_v6 }
 0xc26   :  { %v461_v8 = vsel %vm1056_vm5, %v459_v6, %v460_v7 }
 0xc27   :  { %791 = vtanh.f32 %v461_v8 }
 0xc29   :  { %v457_v9 = vpop.f32.mrf.mxu3 }
 0xc2d   :  { %v792_v10 = vpop.eup %791 }
 0xc2e   :  { %v463_v12 = vmul.f32 0.5, %v792_v10 }
 0xc30   :  { %v464_v13 = vadd.f32 0.5, %v463_v12 }
 0xc31   :  { %v611_v51 = vpop.f32.mrf.mxu3 }
 0xc32   :  { %v465_v14 = vsel %vm1056_vm5, %v792_v10, %v464_v13  ;;  %v612_v52 = vadd.f32 %v769_v50, %v611_v51 }
 0xc33   :  { %468 = vrot.lane.b32.xlu0 %v465_v14, %s965_s25  ;;  %v466_v18 = vmul.f32 %v465_v14, %v430_v61  ;;  %v172_v61 = vpop.f32.mrf.mxu0 }
 0xc34   :  { %v615_v53 = vmul.f32 0.5, %v612_v52  ;;  %v173_v62 = vadd.f32 %v1053_v11, %v172_v61 }
 0xc36   :  { %v616_v54 = vsel %vm1056_vm5, %v612_v52, %v615_v53 }
 0xc39   :  { %v613_v55 = vpop.f32.mrf.mxu3 }
 0xca5   :  { %v469_v15 = vpop.permute.xlu0 %468 }
 0xca6   :  { %v471_v16 = vmul.f32 %v469_v15, %v465_v14 }
 0xca8   :  { %473 = vrot.lane.b32.xlu1 %v471_v16, %s969_s3 }
 0xd1a   :  { %v474_v19 = vpop.permute.xlu1 %473 }
 0xd1b   :  { %v476_v20 = vadd.f32 %v474_v19, %v466_v18  ;;  %v754_v19 = vld [vmem:[#allocation13 + $0x18] sm:$0xff] }
 0xd1c   :  { %682 = vmatpush.bf16.msrb.mxu1 %v754_v19 }
 0xd1d   :  { %793 = vtanh.f32 %v476_v20 }
 0xd23   :  { %v794_v21 = vpop.eup %793 }
 0xd24   :  { %479 = vrot.lane.b32.xlu2 %v794_v21, %s965_s25  ;;  %v752_v21 = vld [vmem:[#allocation13 + $0x8] sm:$0xff] }
 0xd7e   :  { %v480_v25 = vpop.permute.xlu2 %479 }
 0xd7f   :  { %v482_v26 = vmul.f32 %v480_v25, %v465_v14 }
 0xd81   :  { %v485_v27 = vpack.c.bf16 %v482_v26, %v482_v26 }
 0xd83   :  { %487 = vrot.lane.b32.xlu0 %v485_v27, %s969_s3 }
 0xdf5   :  { %v488_v28 = vpop.permute.xlu0 %487 }
 0xdf6   :  { %729 = vmatmul.msk.bf16.vlgmr.msra.gmra.mxu1 %vm109_vm0, %v488_v28 }
 0xe73   :  { %v501_v31 = vpop.f32.mrf.mxu1 }
 0xe74   :  { %v505_v32 = vadd.f32 %v501_v31, %v171_v30  ;;  %v770_v30 = vld [vmem:[%s1170_s7] ss:$0 sm:$0xff] }
 0xe76   :  { %v506_v33 = vmul.f32 0.5, %v505_v32 }
 0xe78   :  { %v507_v34 = vsel %vm1056_vm5, %v505_v32, %v506_v33 }
 0xe79   :  { %795 = vtanh.f32 %v507_v34 }
 0xe7b   :  { %v503_v35 = vpop.f32.mrf.mxu1 }
 0xe7f   :  { %v796_v36 = vpop.eup %795 }
 0xe80   :  { %v509_v37 = vmul.f32 0.5, %v796_v36 }
 0xe82   :  { %v510_v38 = vadd.f32 0.5, %v509_v37 }
 0xe84   :  { %v511_v39 = vsel %vm1056_vm5, %v796_v36, %v510_v38 }
 0xe85   :  { %514 = vrot.lane.b32.xlu1 %v511_v39, %s965_s25  ;;  %v512_v42 = vmul.f32 %v511_v39, %v476_v20  ;;  %v753_v20 = vld [vmem:[#allocation13 + $0x10] sm:$0xff] }
 0xe86   :  { %683 = vmatpush.bf16.msrb.mxu1 %v753_v20 }
 0xe8a   :  { %684 = vmatpush.bf16.msrb.mxu1 %v752_v21 }
 0xe8e   :  { %685 = vmatpush.bf16.msrb.mxu1 %v751_v22 }
 0xef7   :  { %v515_v40 = vpop.permute.xlu1 %514 }
 0xef8   :  { %v517_v41 = vmul.f32 %v515_v40, %v511_v39 }
 0xefa   :  { %519 = vrot.lane.b32.xlu2 %v517_v41, %s969_s3 }
 0xf54   :  { %v520_v43 = vpop.permute.xlu2 %519 }
 0xf55   :  { %v522_v44 = vadd.f32 %v520_v43, %v512_v42 }
 0xf57   :  { %797 = vtanh.f32 %v522_v44 }
 0xf58   :  { %799 = vtanh.f32 %v616_v54 }
 0xf5d   :  { %v798_v45 = vpop.eup %797 }
 0xf5e   :  { %525 = vrot.lane.b32.xlu0 %v798_v45, %s965_s25  ;;  %v800_v56 = vpop.eup %799 }
 0xf5f   :  { %v618_v58 = vmul.f32 0.5, %v800_v56 }
 0xf61   :  { %v619_v59 = vadd.f32 0.5, %v618_v58 }
 0xf63   :  { %v620_v60 = vsel %vm1056_vm5, %v800_v56, %v619_v59 }
 0xfd0   :  { %v526_v47 = vpop.permute.xlu0 %525 }
 0xfd1   :  { %v528_v48 = vmul.f32 %v526_v47, %v511_v39 }
 0xfd3   :  { %v531_v49 = vpack.c.bf16 %v528_v48, %v528_v48 }
 0xfd5   :  { %533 = vrot.lane.b32.xlu1 %v531_v49, %s969_s3 }
 0xfdd   :  { %622 = vrot.lane.b32.xlu1 %v620_v60, %s965_s25 }
0x1047   :  { %v534_v57 = vpop.permute.xlu1 %533 }
0x1048   :  { %730 = vmatmul.msk.bf16.vlgmr.msra.gmra.mxu2 %vm109_vm0, %v534_v57 }
0x104f   :  { %v623_v8 = vpop.permute.xlu1 %622 }
0x1050   :  { %v625_v9 = vmul.f32 %v623_v8, %v620_v60 }
0x10cb   :  { %v547_v63 = vpop.f32.mrf.mxu2 }
0x10cc   :  { %v551_v0 = vadd.f32 %v547_v63, %v173_v62 }
0x10ce   :  { %v552_v1 = vmul.f32 0.5, %v551_v0 }
0x10d0   :  { %v553_v2 = vsel %vm1056_vm5, %v551_v0, %v552_v1 }
0x10d1   :  { %801 = vtanh.f32 %v553_v2 }
0x10d2   :  { %803 = vtanh.f32 %v625_v9 }
0x10d3   :  { %v549_v3 = vpop.f32.mrf.mxu2 }
0x10d7   :  { %v802_v4 = vpop.eup %801 }
0x10d8   :  { %v555_v5 = vmul.f32 0.5, %v802_v4  ;;  %v804_v12 = vpop.eup %803 }
0x10da   :  { %v556_v6 = vadd.f32 0.5, %v555_v5 }
0x10dc   :  { %v557_v7 = vsel %vm1056_vm5, %v802_v4, %v556_v6 }
0x10dd   :  { %560 = vrot.lane.b32.xlu2 %v557_v7, %s965_s25  ;;  %v558_v13 = vmul.f32 %v557_v7, %v522_v44 }
0x1137   :  { %v561_v10 = vpop.permute.xlu2 %560 }
0x1138   :  { %v563_v11 = vmul.f32 %v561_v10, %v557_v7 }
0x113a   :  { %565 = vrot.lane.b32.xlu0 %v563_v11, %s969_s3 }
0x1142   :  { %628 = vrot.lane.b32.xlu0 %v804_v12, %s970_s5 }
0x11ac   :  { %v566_v14 = vpop.permute.xlu0 %565 }
0x11ad   :  { %v568_v15 = vadd.f32 %v566_v14, %v558_v13 }
0x11af   :  { %805 = vtanh.f32 %v568_v15  ;;  %581 = vrot.lane.b32.xlu0 %v568_v15, %s970_s5 }
0x11b4   :  { %v629_v17 = vpop.permute.xlu0 %628 }
0x11b5   :  { %v806_v16 = vpop.eup %805  ;;  %v631_v18 = vmul.f32 %v629_v17, %v620_v60 }
0x11b6   :  { %571 = vrot.lane.b32.xlu2 %v806_v16, %s965_s25 }
0x11be   :  { %633 = vrot.lane.b32.xlu2 %v631_v18, %s965_s25 }
0x1210   :  { %v572_v23 = vpop.permute.xlu2 %571 }
0x1211   :  { %v574_v24 = vmul.f32 %v572_v23, %v557_v7 }
0x1213   :  { %576 = vrot.lane.b32.xlu1 %v574_v24, %s969_s3 }
0x1218   :  { %v634_v26 = vpop.permute.xlu2 %633 }
0x1221   :  { %v582_v25 = vpop.permute.xlu0 %581 }
0x1222   :  { %584 = vst.msk [vmem:[#allocation4] sm:$0xff] %vm109_vm0, %v582_v25 }
0x1285   :  { %v577_v27 = vpop.permute.xlu1 %576 }
0x1286   :  { %579 = vst.msk [vmem:[#allocation3] sm:$0xff] %vm109_vm0, %v577_v27  ;;  %v636_v28 = vsel %vm109_vm0, %v577_v27, %v634_v26 }
0x1287   :  { %v637_v29 = vpack.c.bf16 %v636_v28, %v636_v28 }
0x1289   :  { %748 = vmatmul.msk.bf16.vlgmr.msrb.gmra.mxu1 %vm674_vm6, %v637_v29 }
0x1306   :  { %v687_v31 = vpop.f32.mrf.mxu1 }
0x1307   :  { %v688_v32 = vadd.f32 %v770_v30, %v687_v31 }
0x1309   :  { %691 = vst [vmem:[#allocation14] sm:$0xff] %v688_v32 }
0x130a   :  { %702 = dma.vmem_to_hbm [thread:$0]  %s698_s14, 128, %s700_s17, [#allocation7]  }
0x130e   :  { %v689_v33 = vpop.f32.mrf.mxu1 }
0x130f   :  { %957 = dma.done.wait [#allocation7], 128  }
0x1310   :  { %958 = vsyncadd [#allocation7], 4294967168 }
0x1311   :  { %707 = vsyncpa [#allocation6], 1 }
0x1312   :  { %708 = vsyncpa [#allocation9], 1 }
0x1313   :  { %709 = vsyncpa [#allocation12], 1 }
0x1314   :  { %710 = vsyncpa [#allocation7], 1 }

</bundles_post_ra>
